<compile_context>
chip_gen: v6e
topology: v6e:2x2x1
jax: 0.10.0
libtpu: 0.0.40
codegen_flags: <defaults>
</compile_context>

<pallas_src>
import functools

import jax
import jax.numpy as jnp
from jax.experimental import pallas as pl
from jax.experimental.pallas import tpu as pltpu


def _sigmoid(v):
    # explicit form (exp on EUP + VPU div) -- guaranteed Mosaic lowering
    return 1.0 / (1.0 + jnp.exp(-v))


# --------------------------------------------------------------------------------------
# Stage 1: global average pool -> sigmoid routing -> expert mix -> BN-scale fold.
# Grid: (N, n_spatial_tiles); spatial axis is a reduction ("arbitrary").
# Output: per-sample, BN-scaled 1x1 weight Wfold[n] of shape (C1, C2), bf16 for the MXU.
# --------------------------------------------------------------------------------------
def routing_mix_kernel(x_ref, wr_ref, br_ref, we_ref, scale_ref, wfold_ref, acc_ref,
                       *, inv_hw, num_experts):
    t = pl.program_id(1)

    @pl.when(t == 0)
    def _():
        acc_ref[...] = jnp.zeros_like(acc_ref)

    # partial spatial sum of this tile: (tm, C1) -> (1, C1)
    acc_ref[...] += jnp.sum(x_ref[0].astype(jnp.float32), axis=0, keepdims=True)

    @pl.when(t == pl.num_programs(1) - 1)
    def _():
        pooled = acc_ref[...] * inv_hw            # (1, C1) global average pool
        wr = wr_ref[...]                          # (E, C1)  routing Linear weight
        br = br_ref[...]                          # (1, E)   routing Linear bias
        we = we_ref[...]                          # (E, C1, C2) expert 1x1 weights

        def expert_term(e):
            # routing logit for expert e: <pooled, wr[e]> + br[e]  -> (1, 1)
            logit = jnp.sum(pooled * wr[e:e + 1, :], axis=-1, keepdims=True) \
                    + br[0:1, e:e + 1]
            return _sigmoid(logit) * we[e]        # (C1, C2)

        wmix = expert_term(0)
        for e in range(1, num_experts):
            wmix = wmix + expert_term(e)

        # fold the BatchNorm per-channel scale into the dynamic weight; emit bf16 for MXU
        wfold_ref[0] = (wmix * scale_ref[...]).astype(wfold_ref.dtype)


# --------------------------------------------------------------------------------------
# Stage 2: dynamic 1x1 conv (bf16 MXU matmul, f32 accumulation) + BN shift + SiLU.
# Grid: (N, n_spatial_tiles); both axes independent ("parallel").
# --------------------------------------------------------------------------------------
def dynconv_bn_silu_kernel(x_ref, wfold_ref, shift_ref, out_ref):
    xt = x_ref[0].astype(jnp.bfloat16)                                   # (tm, C1)
    y = jnp.dot(xt, wfold_ref[0], preferred_element_type=jnp.float32)    # (tm, C2)
    y = y + shift_ref[...]                                               # folded BN shift
    out_ref[0] = (y * _sigmoid(y)).astype(out_ref.dtype)                 # SiLU


def dynamic_conv_forward(x_nhwc, params, *, row_tile=512, bn_eps=1e-5):
    """x_nhwc: (N, H, W, C1) float32.  params: [wr, br, we, gamma, beta, mean, var]."""
    wr, br, we, gamma, beta, mean, var = params
    N, H, W, C1 = x_nhwc.shape
    E = wr.shape[0]
    C2 = we.shape[2]
    HW = H * W

    tm = min(row_tile, HW)
    assert HW % tm == 0 and tm % 8 == 0, "row_tile must divide H*W and be a multiple of 8"
    n_tiles = HW // tm

    # Fold inference-mode BatchNorm into per-channel scale / shift (parameter prep).
    inv_std = 1.0 / jnp.sqrt(var.astype(jnp.float32) + bn_eps)
    scale = (gamma.astype(jnp.float32) * inv_std).reshape(1, C2)
    shift = (beta.astype(jnp.float32)
             - mean.astype(jnp.float32) * gamma.astype(jnp.float32) * inv_std).reshape(1, C2)

    x2 = x_nhwc.reshape(N, HW, C1)
    br2 = br.reshape(1, E).astype(jnp.float32)

    vmem_cap = 48 * 1024 * 1024  # leave headroom on v7x's 64 MiB VMEM

    # ---- Stage 1: per-sample dynamic weight -------------------------------------------
    wfold = pl.pallas_call(
        functools.partial(routing_mix_kernel, inv_hw=1.0 / float(HW), num_experts=E),
        out_shape=jax.ShapeDtypeStruct((N, C1, C2), jnp.bfloat16),
        grid_spec=pltpu.PrefetchScalarGridSpec(
            num_scalar_prefetch=0,
            grid=(N, n_tiles),
            in_specs=[
                pl.BlockSpec((1, tm, C1), lambda b, t: (b, t, 0)),
                pl.BlockSpec((E, C1), lambda b, t: (0, 0)),
                pl.BlockSpec((1, E), lambda b, t: (0, 0)),
                pl.BlockSpec((E, C1, C2), lambda b, t: (0, 0, 0)),
                pl.BlockSpec((1, C2), lambda b, t: (0, 0)),
            ],
            out_specs=pl.BlockSpec((1, C1, C2), lambda b, t: (b, 0, 0)),
            scratch_shapes=[pltpu.VMEM((1, C1), jnp.float32)],
        ),
        compiler_params=pltpu.CompilerParams(
            dimension_semantics=("parallel", "arbitrary"),
            vmem_limit_bytes=vmem_cap),
    )(x2, wr.astype(jnp.float32), br2, we.astype(jnp.float32), scale)

    # ---- Stage 2: dynamic 1x1 conv + BN + SiLU ----------------------------------------
    y2 = pl.pallas_call(
        dynconv_bn_silu_kernel,
        out_shape=jax.ShapeDtypeStruct((N, HW, C2), x_nhwc.dtype),
        grid_spec=pltpu.PrefetchScalarGridSpec(
            num_scalar_prefetch=0,
            grid=(N, n_tiles),
            in_specs=[
                pl.BlockSpec((1, tm, C1), lambda b, t: (b, t, 0)),
                pl.BlockSpec((1, C1, C2), lambda b, t: (b, 0, 0)),
                pl.BlockSpec((1, C2), lambda b, t: (0, 0)),
            ],
            out_specs=pl.BlockSpec((1, tm, C2), lambda b, t: (b, t, 0)),
        ),
        compiler_params=pltpu.CompilerParams(
            dimension_semantics=("parallel", "parallel"),
            vmem_limit_bytes=vmem_cap),
    )(x2, wfold, shift)

    return y2.reshape(N, H, W, C2)


def make_params(key, c1, c2, e):
    """Deterministic synthetic parameters.

    wr: (E, C1) routing Linear weight (PyTorch layout), br: (E,) routing bias,
    we: (E, C1, C2) expert 1x1 conv weights stored so that y = x @ We_mixed
        (transpose of the PyTorch (C2, C1) layout),
    gamma/beta/mean/var: (C2,) BatchNorm2d affine + running stats.
    """
    ks = jax.random.split(key, 7)
    wr = (0.1 * jax.random.normal(ks[0], (e, c1))).astype(jnp.float32)
    br = (0.1 * jax.random.normal(ks[1], (e,))).astype(jnp.float32)
    we = (0.1 * jax.random.normal(ks[2], (e, c1, c2))).astype(jnp.float32)
    gamma = (1.0 + 0.1 * jax.random.normal(ks[3], (c2,))).astype(jnp.float32)
    beta = (0.1 * jax.random.normal(ks[4], (c2,))).astype(jnp.float32)
    mean = (0.1 * jax.random.normal(ks[5], (c2,))).astype(jnp.float32)
    var = jax.random.uniform(ks[6], (c2,), jnp.float32, 0.5, 1.5)
    return [wr, br, we, gamma, beta, mean, var]


def ref_forward(x, params, bn_eps=1e-5):
    """Pure-JAX NHWC reference (f32 everywhere), for correctness checking."""
    wr, br, we, gamma, beta, mean, var = params
    pooled = jnp.mean(x, axis=(1, 2))                              # (N, C1)
    r = jax.nn.sigmoid(pooled @ wr.T + br[None, :])                # (N, E)
    wmix = jnp.einsum("ne,ecd->ncd", r, we)                        # (N, C1, C2)
    y = jnp.einsum("nhwc,ncd->nhwd", x, wmix)                      # (N, H, W, C2)
    scale = gamma / jnp.sqrt(var + bn_eps)
    shift = beta - mean * scale
    y = y * scale + shift
    return y * jax.nn.sigmoid(y)                                   # SiLU


if __name__ == "__main__":
    key = jax.random.PRNGKey(0)
    k_x, k_p = jax.random.split(key)

    # NHWC; C1 = C2 = 128 keeps the lane axis fully dense (== NCHW [2, 128, 16, 16]).
    N, H, W, C1, C2, E = 2, 16, 16, 128, 128, 4
    x = jax.random.normal(k_x, (N, H, W, C1), dtype=jnp.float32)
    params = make_params(k_p, C1, C2, E)

    # row_tile=128 exercises the tiled reduction / pipelined path at this small size;
    # use >=512 at production spatial sizes.
    out = dynamic_conv_forward(x, params, row_tile=128)
    out = jax.block_until_ready(out)

    ref = ref_forward(x, params)
    assert out.shape == ref.shape and out.dtype == ref.dtype
    max_err = float(jnp.max(jnp.abs(out - ref)))
    # tolerance accounts for the bf16 MXU inputs (f32 accumulation) in the kernel
    assert jnp.allclose(out, ref, atol=3e-2, rtol=3e-2), f"mismatch vs reference, max_err={max_err}"

    print("KERNEL_OK")
</pallas_src>

<mosaic_0001>
module attributes {stable_mosaic.version = 11 : i64} {
  func.func @routing_mix_kernel(%arg0: i32, %arg1: i32, %arg2: memref<1x128x128xf32, #tpu.memory_space<vmem>>, %arg3: memref<4x128xf32, #tpu.memory_space<vmem>>, %arg4: memref<1x4xf32, #tpu.memory_space<vmem>>, %arg5: memref<4x128x128xf32, #tpu.memory_space<vmem>>, %arg6: memref<1x128xf32, #tpu.memory_space<vmem>>, %arg7: memref<1x128x128xbf16, #tpu.memory_space<vmem>>, %arg8: memref<1x128xf32, #tpu.memory_space<vmem>>) attributes {dimension_semantics = [#tpu.dimension_semantics<parallel>, #tpu.dimension_semantics<arbitrary>], iteration_bounds = array<i64: 2, 2>, scalar_prefetch = 0 : i64, scratch_operands = 1 : i64, tpu.core_type = #tpu.core_type<tc>, window_params = [{transform_indices = @transform_0, window_bounds = array<i64: 1, 128, 128>}, {pipeline_mode = #tpu.pipeline_mode<synchronous>, transform_indices = @transform_1, window_bounds = array<i64: 4, 128>}, {pipeline_mode = #tpu.pipeline_mode<synchronous>, transform_indices = @transform_2, window_bounds = array<i64: 1, 4>}, {pipeline_mode = #tpu.pipeline_mode<synchronous>, transform_indices = @transform_3, window_bounds = array<i64: 4, 128, 128>}, {pipeline_mode = #tpu.pipeline_mode<synchronous>, transform_indices = @transform_4, window_bounds = array<i64: 1, 128>}, {transform_indices = @transform_5, window_bounds = array<i64: 1, 128, 128>}]} {
    %c0_i32 = arith.constant 0 : i32
    %0 = arith.cmpi eq, %arg1, %c0_i32 : i32
    %1 = arith.extui %0 : i1 to i32
    %c0_i32_0 = arith.constant 0 : i32
    %2 = arith.cmpi ne, %1, %c0_i32_0 : i32
    scf.if %2 {
      %cst_8 = arith.constant 0.000000e+00 : f32
      %13 = vector.broadcast %cst_8 : f32 to vector<1x128xf32>
      %c0_9 = arith.constant 0 : index
      %c0_10 = arith.constant 0 : index
      %14 = vector.load %arg8[%c0_9, %c0_10] : memref<1x128xf32, #tpu.memory_space<vmem>>, vector<1x128xf32>
      tpu.vector_store %arg8[%c0_9, %c0_10], %13 {strides = array<i32>} : memref<1x128xf32, #tpu.memory_space<vmem>>, vector<1x128xf32>,
    } else {
    }
    %c0 = arith.constant 0 : index
    %c0_1 = arith.constant 0 : index
    %3 = vector.load %arg8[%c0, %c0_1] : memref<1x128xf32, #tpu.memory_space<vmem>>, vector<1x128xf32>
    %c0_2 = arith.constant 0 : index
    %c0_3 = arith.constant 0 : index
    %c0_4 = arith.constant 0 : index
    %4 = vector.load %arg2[%c0_2, %c0_3, %c0_4] : memref<1x128x128xf32, #tpu.memory_space<vmem>>, vector<1x128x128xf32>
    %5 = vector.shape_cast %4 : vector<1x128x128xf32> to vector<128x128xf32>
    %cst = arith.constant dense<0.000000e+00> : vector<128xf32>
    %6 = vector.multi_reduction <add>, %5, %cst [0] : vector<128x128xf32> to vector<128xf32>
    %7 = vector.shape_cast %6 : vector<128xf32> to vector<1x128xf32>
    %8 = arith.addf %3, %7 : vector<1x128xf32>
    %c0_5 = arith.constant 0 : index
    %c0_6 = arith.constant 0 : index
    %9 = vector.load %arg8[%c0_5, %c0_6] : memref<1x128xf32, #tpu.memory_space<vmem>>, vector<1x128xf32>
    tpu.vector_store %arg8[%c0_5, %c0_6], %8 {strides = array<i32>} : memref<1x128xf32, #tpu.memory_space<vmem>>, vector<1x128xf32>,
    %c1_i32 = arith.constant 1 : i32
    %10 = arith.cmpi eq, %arg1, %c1_i32 : i32
    %11 = arith.extui %10 : i1 to i32
    %c0_i32_7 = arith.constant 0 : i32
    %12 = arith.cmpi ne, %11, %c0_i32_7 : i32
    scf.if %12 {
      %c0_8 = arith.constant 0 : index
      %c0_9 = arith.constant 0 : index
      %13 = vector.load %arg8[%c0_8, %c0_9] : memref<1x128xf32, #tpu.memory_space<vmem>>, vector<1x128xf32>
      %cst_10 = arith.constant 3.906250e-03 : f32
      %14 = vector.broadcast %cst_10 : f32 to vector<1x128xf32>
      %15 = arith.mulf %13, %14 : vector<1x128xf32>
      %c0_11 = arith.constant 0 : index
      %c0_12 = arith.constant 0 : index
      %16 = vector.load %arg3[%c0_11, %c0_12] : memref<4x128xf32, #tpu.memory_space<vmem>>, vector<4x128xf32>
      %c0_13 = arith.constant 0 : index
      %c0_14 = arith.constant 0 : index
      %17 = vector.load %arg4[%c0_13, %c0_14] : memref<1x4xf32, #tpu.memory_space<vmem>>, vector<1x4xf32>
      %c0_15 = arith.constant 0 : index
      %c0_16 = arith.constant 0 : index
      %c0_17 = arith.constant 0 : index
      %18 = vector.load %arg5[%c0_15, %c0_16, %c0_17] : memref<4x128x128xf32, #tpu.memory_space<vmem>>, vector<4x128x128xf32>
      %19 = vector.extract_strided_slice %16 {offsets = [0, 0], sizes = [1, 128], strides = [1, 1]} : vector<4x128xf32> to vector<1x128xf32>
      %20 = arith.mulf %15, %19 : vector<1x128xf32>
      %cst_18 = arith.constant dense<0.000000e+00> : vector<1xf32>
      %21 = vector.multi_reduction <add>, %20, %cst_18 [1] : vector<1x128xf32> to vector<1xf32>
      %22 = vector.shape_cast %21 : vector<1xf32> to vector<1x1xf32>
      %23 = vector.extract_strided_slice %17 {offsets = [0, 0], sizes = [1, 1], strides = [1, 1]} : vector<1x4xf32> to vector<1x1xf32>
      %24 = arith.addf %22, %23 : vector<1x1xf32>
      %cst_19 = arith.constant 0.000000e+00 : f32
      %25 = vector.broadcast %cst_19 : f32 to vector<1x1xf32>
      %26 = arith.subf %25, %24 : vector<1x1xf32>
      %27 = math.exp %26 : vector<1x1xf32>
      %cst_20 = arith.constant 1.000000e+00 : f32
      %28 = vector.broadcast %cst_20 : f32 to vector<1x1xf32>
      %29 = arith.addf %28, %27 : vector<1x1xf32>
      %cst_21 = arith.constant 1.000000e+00 : f32
      %30 = vector.broadcast %cst_21 : f32 to vector<1x1xf32>
      %31 = arith.divf %30, %29 : vector<1x1xf32>
      %32 = vector.extract_strided_slice %18 {offsets = [0, 0, 0], sizes = [1, 128, 128], strides = [1, 1, 1]} : vector<4x128x128xf32> to vector<1x128x128xf32>
      %33 = vector.shape_cast %32 : vector<1x128x128xf32> to vector<128x128xf32>
      %34 = vector.broadcast %31 : vector<1x1xf32> to vector<128x128xf32>
      %35 = arith.mulf %34, %33 : vector<128x128xf32>
      %36 = vector.extract_strided_slice %16 {offsets = [1, 0], sizes = [1, 128], strides = [1, 1]} : vector<4x128xf32> to vector<1x128xf32>
      %37 = arith.mulf %15, %36 : vector<1x128xf32>
      %cst_22 = arith.constant dense<0.000000e+00> : vector<1xf32>
      %38 = vector.multi_reduction <add>, %37, %cst_22 [1] : vector<1x128xf32> to vector<1xf32>
      %39 = vector.shape_cast %38 : vector<1xf32> to vector<1x1xf32>
      %40 = vector.extract_strided_slice %17 {offsets = [0, 1], sizes = [1, 1], strides = [1, 1]} : vector<1x4xf32> to vector<1x1xf32>
      %41 = arith.addf %39, %40 : vector<1x1xf32>
      %cst_23 = arith.constant 0.000000e+00 : f32
      %42 = vector.broadcast %cst_23 : f32 to vector<1x1xf32>
      %43 = arith.subf %42, %41 : vector<1x1xf32>
      %44 = math.exp %43 : vector<1x1xf32>
      %cst_24 = arith.constant 1.000000e+00 : f32
      %45 = vector.broadcast %cst_24 : f32 to vector<1x1xf32>
      %46 = arith.addf %45, %44 : vector<1x1xf32>
      %cst_25 = arith.constant 1.000000e+00 : f32
      %47 = vector.broadcast %cst_25 : f32 to vector<1x1xf32>
      %48 = arith.divf %47, %46 : vector<1x1xf32>
      %49 = vector.extract_strided_slice %18 {offsets = [1, 0, 0], sizes = [1, 128, 128], strides = [1, 1, 1]} : vector<4x128x128xf32> to vector<1x128x128xf32>
      %50 = vector.shape_cast %49 : vector<1x128x128xf32> to vector<128x128xf32>
      %51 = vector.broadcast %48 : vector<1x1xf32> to vector<128x128xf32>
      %52 = arith.mulf %51, %50 : vector<128x128xf32>
      %53 = arith.addf %35, %52 : vector<128x128xf32>
      %54 = vector.extract_strided_slice %16 {offsets = [2, 0], sizes = [1, 128], strides = [1, 1]} : vector<4x128xf32> to vector<1x128xf32>
      %55 = arith.mulf %15, %54 : vector<1x128xf32>
      %cst_26 = arith.constant dense<0.000000e+00> : vector<1xf32>
      %56 = vector.multi_reduction <add>, %55, %cst_26 [1] : vector<1x128xf32> to vector<1xf32>
      %57 = vector.shape_cast %56 : vector<1xf32> to vector<1x1xf32>
      %58 = vector.extract_strided_slice %17 {offsets = [0, 2], sizes = [1, 1], strides = [1, 1]} : vector<1x4xf32> to vector<1x1xf32>
      %59 = arith.addf %57, %58 : vector<1x1xf32>
      %cst_27 = arith.constant 0.000000e+00 : f32
      %60 = vector.broadcast %cst_27 : f32 to vector<1x1xf32>
      %61 = arith.subf %60, %59 : vector<1x1xf32>
      %62 = math.exp %61 : vector<1x1xf32>
      %cst_28 = arith.constant 1.000000e+00 : f32
      %63 = vector.broadcast %cst_28 : f32 to vector<1x1xf32>
      %64 = arith.addf %63, %62 : vector<1x1xf32>
      %cst_29 = arith.constant 1.000000e+00 : f32
      %65 = vector.broadcast %cst_29 : f32 to vector<1x1xf32>
      %66 = arith.divf %65, %64 : vector<1x1xf32>
      %67 = vector.extract_strided_slice %18 {offsets = [2, 0, 0], sizes = [1, 128, 128], strides = [1, 1, 1]} : vector<4x128x128xf32> to vector<1x128x128xf32>
      %68 = vector.shape_cast %67 : vector<1x128x128xf32> to vector<128x128xf32>
      %69 = vector.broadcast %66 : vector<1x1xf32> to vector<128x128xf32>
      %70 = arith.mulf %69, %68 : vector<128x128xf32>
      %71 = arith.addf %53, %70 : vector<128x128xf32>
      %72 = vector.extract_strided_slice %16 {offsets = [3, 0], sizes = [1, 128], strides = [1, 1]} : vector<4x128xf32> to vector<1x128xf32>
      %73 = arith.mulf %15, %72 : vector<1x128xf32>
      %cst_30 = arith.constant dense<0.000000e+00> : vector<1xf32>
      %74 = vector.multi_reduction <add>, %73, %cst_30 [1] : vector<1x128xf32> to vector<1xf32>
      %75 = vector.shape_cast %74 : vector<1xf32> to vector<1x1xf32>
      %76 = vector.extract_strided_slice %17 {offsets = [0, 3], sizes = [1, 1], strides = [1, 1]} : vector<1x4xf32> to vector<1x1xf32>
      %77 = arith.addf %75, %76 : vector<1x1xf32>
      %cst_31 = arith.constant 0.000000e+00 : f32
      %78 = vector.broadcast %cst_31 : f32 to vector<1x1xf32>
      %79 = arith.subf %78, %77 : vector<1x1xf32>
      %80 = math.exp %79 : vector<1x1xf32>
      %cst_32 = arith.constant 1.000000e+00 : f32
      %81 = vector.broadcast %cst_32 : f32 to vector<1x1xf32>
      %82 = arith.addf %81, %80 : vector<1x1xf32>
      %cst_33 = arith.constant 1.000000e+00 : f32
      %83 = vector.broadcast %cst_33 : f32 to vector<1x1xf32>
      %84 = arith.divf %83, %82 : vector<1x1xf32>
      %85 = vector.extract_strided_slice %18 {offsets = [3, 0, 0], sizes = [1, 128, 128], strides = [1, 1, 1]} : vector<4x128x128xf32> to vector<1x128x128xf32>
      %86 = vector.shape_cast %85 : vector<1x128x128xf32> to vector<128x128xf32>
      %87 = vector.broadcast %84 : vector<1x1xf32> to vector<128x128xf32>
      %88 = arith.mulf %87, %86 : vector<128x128xf32>
      %89 = arith.addf %71, %88 : vector<128x128xf32>
      %c0_34 = arith.constant 0 : index
      %c0_35 = arith.constant 0 : index
      %90 = vector.load %arg6[%c0_34, %c0_35] : memref<1x128xf32, #tpu.memory_space<vmem>>, vector<1x128xf32>
      %91 = vector.broadcast %90 : vector<1x128xf32> to vector<128x128xf32>
      %92 = arith.mulf %89, %91 : vector<128x128xf32>
      %93 = arith.truncf %92 : vector<128x128xf32> to vector<128x128xbf16>
      %c0_36 = arith.constant 0 : index
      %c0_37 = arith.constant 0 : index
      %c0_38 = arith.constant 0 : index
      %94 = vector.load %arg7[%c0_36, %c0_37, %c0_38] : memref<1x128x128xbf16, #tpu.memory_space<vmem>>, vector<1x128x128xbf16>
      %95 = vector.shape_cast %94 : vector<1x128x128xbf16> to vector<128x128xbf16>
      %96 = vector.shape_cast %93 : vector<128x128xbf16> to vector<1x128x128xbf16>
      tpu.vector_store %arg7[%c0_36, %c0_37, %c0_38], %96 {strides = array<i32>} : memref<1x128x128xbf16, #tpu.memory_space<vmem>>, vector<1x128x128xbf16>,
    } else {
    }
    return
  }
  func.func @transform_0(%arg0: i32, %arg1: i32) -> (i32, i32, i32) {
    %c0_i32 = arith.constant 0 : i32
    %c0_i32_0 = arith.constant 0 : i32
    return %arg0, %arg1, %c0_i32 : i32, i32, i32
  }
  func.func @transform_1(%arg0: i32, %arg1: i32) -> (i32, i32) {
    %c0_i32 = arith.constant 0 : i32
    %c0_i32_0 = arith.constant 0 : i32
    %c0_i32_1 = arith.constant 0 : i32
    return %c0_i32, %c0_i32_0 : i32, i32
  }
  func.func @transform_2(%arg0: i32, %arg1: i32) -> (i32, i32) {
    %c0_i32 = arith.constant 0 : i32
    %c0_i32_0 = arith.constant 0 : i32
    %c0_i32_1 = arith.constant 0 : i32
    return %c0_i32, %c0_i32_0 : i32, i32
  }
  func.func @transform_3(%arg0: i32, %arg1: i32) -> (i32, i32, i32) {
    %c0_i32 = arith.constant 0 : i32
    %c0_i32_0 = arith.constant 0 : i32
    %c0_i32_1 = arith.constant 0 : i32
    %c0_i32_2 = arith.constant 0 : i32
    return %c0_i32, %c0_i32_0, %c0_i32_1 : i32, i32, i32
  }
  func.func @transform_4(%arg0: i32, %arg1: i32) -> (i32, i32) {
    %c0_i32 = arith.constant 0 : i32
    %c0_i32_0 = arith.constant 0 : i32
    %c0_i32_1 = arith.constant 0 : i32
    return %c0_i32, %c0_i32_0 : i32, i32
  }
  func.func @transform_5(%arg0: i32, %arg1: i32) -> (i32, i32, i32) {
    %c0_i32 = arith.constant 0 : i32
    %c0_i32_0 = arith.constant 0 : i32
    %c0_i32_1 = arith.constant 0 : i32
    return %arg0, %c0_i32, %c0_i32_0 : i32, i32, i32
  }
}

</mosaic_0001>

<bundles_post_ra>
// kernel: tpu_custom_call.1
= control target key start
LH: loop header
LB: loop body
LE: loop exit
PB: predicated region body
PF: predicated region fallthrough
CT: control target
= control target key end

     0   :  { %s1656_s0 = inlined_call_operand.hbm [shape: f32[2,256,128], index: 0, kind: input, shape index: {}]   ;;  %s1657_s1 = inlined_call_operand.hbm [shape: f32[4,128], index: 1, kind: input, shape index: {}]   ;;  %s1658_s2 = inlined_call_operand.vmem [shape: f32[1,4], index: 2, kind: input, shape index: {}]   ;;  %s1659_s3 = inlined_call_operand.hbm [shape: f32[4,128,128], index: 3, kind: input, shape index: {}]   ;;  %s1660_s4 = inlined_call_operand.vmem [shape: f32[1,128], index: 4, kind: input, shape index: {}]   ;;  %s1661_s5 = inlined_call_operand.hbm [shape: bf16[2,128,128], index: 5, kind: output, shape index: {}]  }
   0x1   :  { %1678 = sst [smem:[#allocation20_spill]] %s1657_s1 }
   0x2   :  { %1679 = sst [smem:[#allocation21_spill]] %s1658_s2 }
   0x3   :  { %1680 = sst [smem:[#allocation22_spill]] %s1659_s3 }
   0x4   :  { %1681 = sst [smem:[#allocation23_spill]] %s1660_s4 }
   0x5   :  { %1682 = sst [smem:[#allocation24_spill]] %s1661_s5 }
   0x6   :  { %10 = vsyncpa [#allocation4], 0 }
   0x7   :  { %12 = vsyncpa [#allocation4 + $0x1], 0 }
   0x8   :  { %13 = vsyncpa [#allocation7], 0 }
   0x9   :  { %14 = vsyncpa [#allocation5], 0 }
   0xa   :  { %16 = vsyncpa [#allocation5 + $0x1], 0  ;;  %s1350_s18 = smov 0   ;;  %s1352_s19 = smov 0  }
   0xb   :  { %s1354_s20 = smov 0   ;;  %s1356_s21 = smov 0  }
   0xc   :  { %s1358_s22 = smov 0   ;;  %s1360_s23 = smov 0  }
   0xd   :  { %s1362_s24 = smov 0   ;;  %s1364_s25 = smov 0  }
   0xe   :  { %s1366_s26 = smov 0   ;;  %s1368_s27 = smov 0  }
   0xf   :  { %s1370_s28 = smov 0  }
  0x10 LB: > { %1683 = sst [smem:[#allocation13_spill]] %s1265_s18  ;;  %s842_s29 = sadd.s32 4294967295, %s1305_s28   ;;  %s1305_s28 = sphi %s1370_s28, %s22_s28   ;;  %s1301_s27 = sphi %s1368_s27, %s1728_s27   ;;  %s1297_s26 = sphi %s1366_s26, %s1727_s26   ;;  %s1293_s25 = sphi %s1364_s25, %s1726_s25   ;;  %s1289_s24 = sphi %s1362_s24, %s1718_s24   ;;  %s1285_s23 = sphi %s1360_s23, %s1725_s23   ;;  %s1281_s22 = sphi %s1358_s22, %s1724_s22   ;;  %s1277_s21 = sphi %s1356_s21, %s1723_s21   ;;  %s1273_s20 = sphi %s1354_s20, %s1722_s20   ;;  %s1269_s19 = sphi %s1352_s19, %s1721_s19   ;;  %s1265_s18 = sphi %s1350_s18, %s1720_s18  }
  0x11   : > { %1684 = sst [smem:[#allocation14_spill]] %s1293_s25  ;;  %s843_s30 = sadd.s32 4294967294, %s1305_s28  }
  0x12   : > { %1685 = sst [smem:[#allocation15_spill]] %s1297_s26  ;;  %p50_p0 = scmp.ne.s32.totalorder %s1285_s23, %s1281_s22 }
  0x13   : > { %1686 = sst [smem:[#allocation16_spill]] %s1305_s28  ;;  %p51_p1 = scmp.eq.s32.totalorder %s1305_s28, 0 }
  0x14   : > { %p56_p2 = scmp.ne.s32.totalorder %s1281_s22, %s1277_s21  ;;  %p1410_p3 = scmp.eq.s32.totalorder %s842_s29, 0 }
  0x15   : > { %p1415_p4 = por %p51_p1, %p50_p0  ;;  %p163_p5 = scmp.ne.s32.totalorder %s1273_s20, %s1269_s19 }
  0x16   : > { %s1687_s7 = scalar_select %p1410_p3, 1, 0 }
  0x17   : > { %p1423_p6 = por %p1410_p3, %p56_p2  ;;  %p164_p7 = scmp.eq.s32.totalorder %s842_s29, 3 }
  0x18   : > { %p169_p8 = scmp.ne.s32.totalorder %s1269_s19, %s1265_s18  ;;  %p170_p9 = scmp.eq.s32.totalorder %s843_s30, 3 }
  0x19   : > { %s1689_s10 = scalar_select %p1423_p6, 1, 0 }
  0x1a   : > { %p1429_p10 = por %p164_p7, %p163_p5  ;;  %p844_p11 = scmp.ge.s32.totalorder %s1305_s28, 1 }
  0x1b   : > { %p1434_p12 = por %p170_p9, %p169_p8  ;;  %p177_p13 = scmp.lt.s32.totalorder %s1305_s28, 5 }
  0x1c   : > { %s1690_s11 = scalar_select %p1429_p10, 1, 0 }
  0x1d   : > { %s1692_s12 = scalar_select %p1434_p12, 1, 0 }
  0x1e   : > { %1691 = sst [smem:[#allocation17_spill]] %s1690_s11  ;;  %p1439_p0 = pnand %p844_p11, %p177_p13 }
  0x1f   : > { %1693 = sst [smem:[#allocation18_spill]] %s1692_s12  ;;  %s1307_s14 = smov [#allocation6]  }
  0x20   : > { %s1694_s13 = scalar_select %p1439_p0, 1, 0 }
  0x21   : > { %s190_s15 = sshll.u32 %s1307_s14, 4  ;;  %p965_p1 = pneg %p1439_p0  ;;  %s191_s15 = int_to_ptr.vmem [resolvable:$true] %s190_s15 }
  0x22   : > { %p982_p2 = scmp.lt.s32.totalorder %s1305_s28, 4  ;;  %s1308_s21 = smov [#allocation8]  }
  0x23   : > { %p1448_p5 = pnand %p965_p1, %p1410_p3  ;;  %s203_s29 = sshll.u32 %s1308_s21, 4  ;;  %s204_s29 = int_to_ptr.vmem [resolvable:$true] %s203_s29 }
  0x24   : > { %p1454_p7 = pnand %p982_p2, %p1415_p4  ;;  %s1112_s30 = scalar_lea.vmem %s191_s15, 64 }
  0x25   : > { %p1103_p8 = pneg %p1448_p5  ;;  %p1113_p9 = scmp.ne.s32.totalorder %s191_s15, %s1112_s30 }
  0x26   : > { %p1120_p1 = scmp.lt.s32.totalorder %s191_s15, %s191_s15  ;;  %p1121_p12 = scmp.lt.s32.totalorder %s1112_s30, %s1112_s30 }
  0x27   : > { %p1115_p11 = pnand %p1113_p9, %p1103_p8 }
  0x28   : > { %p1122_p10 = por %p1121_p12, %p1120_p1 }
  0x29   : > { %p1116_p13 = pneg %p1115_p11 }
  0x2b   : > { %p1123_p3 = pnand %p1122_p10, %p1116_p13 }
  0x2d   : > { %1126 = shalt.err (!%p1123_p3)
}
  0x2e   : > { %s1697_s1 = sld [smem:[#allocation20_spill]]  ;;  %s1138_s21 = scalar_lea.vmem %s204_s29, 8192 }
  0x2f   : > { %p1139_p4 = scmp.ne.s32.totalorder %s204_s29, %s1138_s21  ;;  %p1146_p11 = scmp.lt.s32.totalorder %s204_s29, %s204_s29 }
  0x30   : > { %p1147_p6 = scmp.lt.s32.totalorder %s1138_s21, %s1138_s21 }
  0x31   : > { %p1141_p2 = pnand %p1139_p4, %p1103_p8 }
  0x32   : > { %p1148_p0 = por %p1147_p6, %p1146_p11 }
  0x33   : > { %p1142_p9 = pneg %p1141_p2 }
  0x34   : > { %968 = dma.hbm_to_vmem [thread:$0]  (!%p1448_p5), %s1697_s1, 64, %s191_s15, [#allocation7]  }
  0x35   : > { %p1149_p12 = pnand %p1148_p0, %p1142_p9 }
  0x37   : > { %1152 = shalt.err (!%p1149_p12)
}
  0x38   : > { %s1668_s30 = smov 128   ;;  %s1669_s15 = smov 8  }
  0x39   : > { %s1698_s3 = sld [smem:[#allocation22_spill]]  ;;  %s31_s21 = sadd.s32 1, %s1297_s26 }
  0x3a   : > { %p32_p3 = scmp.ge.s32.totalorder %s31_s21, 2  ;;  %s34_s6 = sadd.s32 1, %s1301_s27 }
  0x3b   : > { %s220_s8 = sand.u32 1, %s1285_s23   ;;  %s849_s1 = sshll.u32 %s1297_s26, 4 }
  0x3c   : > { %s1730_s21 = smov (%p32_p3, %s31_s21), 0  ;;  %s1732_s6 = smov (!%p32_p3, %s34_s6), %s1301_s27 }
  0x3d   : > { %1699 = sst [smem:[#allocation19_spill]] %s1730_s21  ;;  %s39_s16 = ssub.s32 %s1297_s26, %s1730_s21 }
  0x3e   : > { %p36_p6 = scmp.ge.s32.totalorder %s1732_s6, 2  ;;  %s848_s12 = sshll.u32 %s220_s8, 7 }
  0x3f   : > { %971 = dma.hbm_to_vmem [thread:$0]  (!%p1448_p5), %s1698_s3, 8192, %s204_s29, [#allocation7], %s1668_s30, %s1668_s30, %s1669_s15  }
  0x40   : > { %s850_s9 = sshll.u32 %s1301_s27, 5  ;;  %s1734_s6 = smov (%p36_p6, %s1732_s6), 0 }
  0x41   : > { %s230_s29 = sadd.s32 %s850_s9, %s849_s1  ;;  %s224_s14 = scalar_lea.vmem [#allocation3], %s848_s12 }
  0x42   : > { %s233_s30 = sshll.u32 %s224_s14, 4  ;;  %s38_s15 = ssub.s32 %s1301_s27, %s1734_s6  ;;  %s234_s30 = int_to_ptr.vmem [resolvable:$true] %s233_s30 }
  0x43   : > { %s851_s3 = sshll.u32 %s230_s29, 7  ;;  %s40_s18 = sor.u32 %s39_s16, %s38_s15 }
  0x44   : > { %p151_p10 = scmp.eq.s32.totalorder %s38_s15, 0  ;;  %p41_p0 = scmp.eq.s32.totalorder %s40_s18, 0 }
  0x45   : > { %s232_s11 = scalar_lea.hbm %s1656_s0, %s851_s3  ;;  %s1700_s21 = sadd.s32 1, %s1273_s20 }
  0x46   : > { %s1499_s26 = scalar_select %p151_p10, %s1273_s20, %s1700_s21  }
  0x47   : > { %s1701_s25 = sadd.s32 1, %s1285_s23  ;;  %s221_s2 = scalar_lea.sflag [#allocation4], %s220_s8 }
  0x48   : > { %s1504_s4 = scalar_select %p41_p0, %s1285_s23, %s1701_s25  }
  0x49   : > { %p1155_p5 = pneg %p1454_p7  ;;  %s1166_s1 = scalar_lea.vmem %s234_s30, 2048 }
  0x4a   : > { %p1167_p8 = scmp.ne.s32.totalorder %s234_s30, %s1166_s1  ;;  %s1311_s12 = smov [#allocation3]  }
  0x4b   : > { %s1171_s18 = sshll.u32 %s1311_s12, 4  ;;  %s1172_s18 = int_to_ptr.vmem [resolvable:$false] %s1171_s18 }
  0x4c   : > { %p1169_p13 = pnand %p1167_p8, %p1155_p5  ;;  %s1173_s15 = scalar_lea.vmem %s1172_s18, 4096 }
  0x4d   : > { %p1174_p4 = scmp.lt.s32.totalorder %s234_s30, %s1172_s18  ;;  %p1175_p2 = scmp.lt.s32.totalorder %s1173_s15, %s1166_s1 }
  0x4e   : > { %p1170_p1 = pneg %p1169_p13 }
  0x4f   : > { %p1176_p9 = por %p1175_p2, %p1174_p4 }
  0x51   : > { %p1177_p11 = pnand %p1176_p9, %p1170_p1 }
  0x53   : > { %1180 = shalt.err (!%p1177_p11)
}
  0x54   : > { %s1702_s3 = smov 8   ;;  %s1703_s5 = smov 128  }
  0x55   : > { %975 = dma.hbm_to_vmem [thread:$0]  (!%p1454_p7), %s232_s11, 2048, %s234_s30, %s221_s2, %s1703_s5, %s1703_s5, %s1702_s3  }
  0x56   : > { %p1704_p12 = scmp.ne.s32.totalorder %s1694_s13, 0 }
  0x57   : > { %s247_s25 = sand.u32 (!%p1704_p12), 1, %s1281_s22   ;;  %p1705_p3 = scmp.ne.s32.totalorder (!%p1704_p12), %s1689_s10, 0 }
  0x58   : > { %245 = sbr.rel (%p1704_p12) target bundleno = 460 (0x1cc), region = 40  ;;  %s853_s28 = sshll.u32 (!%p1704_p12), %s247_s25, 7 }
  0x59   : > { %s248_s8 = scalar_lea.sflag (!%p1704_p12), [#allocation4], %s247_s25  ;;  %s1516_s21 = scalar_lea.vmem (!%p1704_p12), [#allocation3], %s853_s28 }
  0x5d   : > { %1252 = dma.done.wait (%p1705_p3), %s248_s8, 2048  }
  0x5e   : > { %1254 = vsyncadd (%p1705_p3), %s248_s8, 4294965248  ;;  %p1706_p6 = scmp.ne.s32.totalorder %s1687_s7, 0 }
  0x60   : > { %1256 = dma.done.wait (%p1706_p6), [#allocation7], 8256  }
  0x61   : > { %1258 = vsyncadd (%p1706_p6), [#allocation7], 4294959040  ;;  %s283_s2 = sand.u32 1, %s1269_s19   ;;  %p857_p7 = scmp.ne.s32.totalorder %s1289_s24, 0 }
  0x62   : > { %s856_s11 = sshll.u32 %s283_s2, 6 }
  0x63   : > { %s1529_s13 = scalar_lea.vmem [#allocation9], %s856_s11  ;;  %290 = sbr.rel (%p857_p7) target bundleno = 106 (0x6a), region = 56 }
  0x68   : > { %v1312_v0 = vmov 0.0  }
  0x69   : > { %291 = vst [vmem:[#allocation2] sm:$0x1] %v1312_v0 }
  0x6a PF: > { %v293_v1 = vld [vmem:[%s1516_s21] sm:$0xff]  ;;  %v294_v2 = vld [vmem:[%s1516_s21 + $0x8] sm:$0xff]  ;;  %v295_v3 = vld [vmem:[%s1516_s21 + $0x10] sm:$0xff]  ;;  %p858_p10 = scmp.ne.s32.totalorder %s1289_s24, 1 }
  0x6b   : > { %v309_v4 = vadd.f32 %v294_v2, %v293_v1  ;;  %v296_v5 = vld [vmem:[%s1516_s21 + $0x18] sm:$0xff]  ;;  %v297_v7 = vld [vmem:[%s1516_s21 + $0x20] sm:$0xff]  ;;  %v298_v9 = vld [vmem:[%s1516_s21 + $0x28] sm:$0xff]  ;;  %s1707_s10 = sld [smem:[#allocation21_spill]] (!%p858_p10)  ;;  %s1314_s17 = smov (!%p858_p10), 126  }
  0x6c   : > { %v299_v11 = vld [vmem:[%s1516_s21 + $0x30] sm:$0xff]  ;;  %v300_v13 = vld [vmem:[%s1516_s21 + $0x38] sm:$0xff]  ;;  %v301_v15 = vld [vmem:[%s1516_s21 + $0x40] sm:$0xff]  ;;  %s1315_s30 = smov (!%p858_p10), 127   ;;  %s1316_s16 = smov (!%p858_p10), 125  }
  0x6d   : > { %v310_v6 = vadd.f32 %v309_v4, %v295_v3  ;;  %v302_v17 = vld [vmem:[%s1516_s21 + $0x48] sm:$0xff]  ;;  %v303_v19 = vld [vmem:[%s1516_s21 + $0x50] sm:$0xff]  ;;  %v304_v21 = vld [vmem:[%s1516_s21 + $0x58] sm:$0xff]  ;;  %s1708_s15 = sld [smem:[#allocation23_spill]] (!%p858_p10) }
  0x6e   : > { %v305_v23 = vld [vmem:[%s1516_s21 + $0x60] sm:$0xff]  ;;  %v306_v25 = vld [vmem:[%s1516_s21 + $0x68] sm:$0xff]  ;;  %v307_v27 = vld [vmem:[%s1516_s21 + $0x70] sm:$0xff] }
  0x6f   : > { %v311_v8 = vadd.f32 %v310_v6, %v296_v5  ;;  %v308_v29 = vld [vmem:[%s1516_s21 + $0x78] sm:$0xff] }
  0x70   : > { %v292_v37 = vld [vmem:[#allocation2] sm:$0x1] }
  0x71   : > { %v312_v10 = vadd.f32 %v311_v8, %v297_v7 }
  0x73   : > { %v313_v12 = vadd.f32 %v312_v10, %v298_v9 }
  0x75   : > { %v314_v14 = vadd.f32 %v313_v12, %v299_v11 }
  0x77   : > { %v315_v16 = vadd.f32 %v314_v14, %v300_v13 }
  0x79   : > { %v316_v18 = vadd.f32 %v315_v16, %v301_v15 }
  0x7b   : > { %v317_v20 = vadd.f32 %v316_v18, %v302_v17 }
  0x7d   : > { %v318_v22 = vadd.f32 %v317_v20, %v303_v19 }
  0x7f   : > { %v319_v24 = vadd.f32 %v318_v22, %v304_v21 }
  0x81   : > { %v320_v26 = vadd.f32 %v319_v24, %v305_v23 }
  0x83   : > { %v321_v28 = vadd.f32 %v320_v26, %v306_v25 }
  0x85   : > { %v322_v30 = vadd.f32 %v321_v28, %v307_v27 }
  0x87   : > { %v323_v31 = vadd.f32 %v322_v30, %v308_v29 }
  0x89   : > { %v324_v32 = vrot.slane %v323_v31, 4 }
  0x8b   : > { %v325_v33 = vadd.f32 %v324_v32, %v323_v31 }
  0x8d   : > { %v326_v34 = vrot.slane %v325_v33, 2 }
  0x8f   : > { %v327_v35 = vadd.f32 %v326_v34, %v325_v33 }
  0x91   : > { %v328_v36 = vrot.slane %v327_v35, 1 }
  0x93   : > { %v329_v38 = vadd.f32 %v328_v36, %v327_v35  ;;  %335 = sbr.rel (%p858_p10) target bundleno = 432 (0x1b0), region = 60 }
  0x95   : > { %v330_v39 = vadd.f32 %v329_v38, %v292_v37 }
  0x97   : > { %331 = vst [vmem:[#allocation2] sm:$0x1] %v330_v39 }
  0x98   : > { %v440_v41 = vlaneseq  ;;  %v338_v43 = vld [vmem:[#allocation6] sm:$0xf]  ;;  %vm405_vm0 = vcmask 1040384   ;;  %v1313_v44 = vmov 1966171168   ;;  %v340_v33 = vld [vmem:[#allocation8] sm:$0xff] }
  0x99   : > { %v438_v45 = vunpack.c.l.s4 %v1313_v44  ;;  %v339_v0 = vld [vmem:[%s1707_s10] sm:$0x1]  ;;  %v341_v34 = vld [vmem:[#allocation8 + $0x8] sm:$0xff]  ;;  %v342_v35 = vld [vmem:[#allocation8 + $0x10] sm:$0xff] }
  0x9a   : > { %v441_v46 = vshrl.u32 %v440_v41, 7  ;;  %v343_v36 = vld [vmem:[#allocation8 + $0x18] sm:$0xff]  ;;  %v344_v37 = vld [vmem:[#allocation8 + $0x20] sm:$0xff]  ;;  %v345_v38 = vld [vmem:[#allocation8 + $0x28] sm:$0xff] }
  0x9b   : > { %v439_v48 = vunpack.c.0.s8 %v438_v45  ;;  %v346_v39 = vld [vmem:[#allocation8 + $0x30] sm:$0xff]  ;;  %v348_v41 = vld [vmem:[#allocation8 + $0x40] sm:$0xff]  ;;  %v351_v45 = vld [vmem:[#allocation8 + $0x58] sm:$0xff] }
  0x9c   : > { %v467_v63 = vsub.s32 0, %v441_v46  ;;  %v350_v44 = vld [vmem:[#allocation8 + $0x50] sm:$0xff] }
  0x9d   : > { %v442_v50 = vsub.s32 %v439_v48, %v441_v46  ;;  %v352_v46 = vld [vmem:[#allocation8 + $0x60] sm:$0xff]  ;;  %v354_v48 = vld [vmem:[#allocation8 + $0x70] sm:$0xff] }
  0x9e   : > { %v336_v40 = vld [vmem:[#allocation2] sm:$0x1]  ;;  %v468_v1 = vrot.slane %v339_v0, %v467_v63 }
  0x9f   : > { %v337_v42 = vmul.f32 0.00390625, %v336_v40  ;;  %v443_v51 = vrot.slane %v338_v43, %v442_v50  ;;  %v347_v40 = vld [vmem:[#allocation8 + $0x38] sm:$0xff] }
  0xa1   : > { %v404_v47 = vmul.f32 %v338_v43, %v337_v42  ;;  %v444_v52 = vcombine.high %v443_v51, %v443_v51  ;;  %v451_v53 = vrot.slane %v443_v51, %v442_v50  ;;  %v349_v43 = vld [vmem:[#allocation8 + $0x48] sm:$0xff] }
  0xa3   : > { %v406_v49 = vsel %vm405_vm0, %v404_v47, 0.0  ;;  %v515_v54 = vcombine.high %v451_v53, %v451_v53  ;;  %v458_v55 = vrot.slane %v444_v52, %v442_v50  ;;  %v353_v47 = vld [vmem:[#allocation8 + $0x68] sm:$0xff]  ;;  %v356_v53 = vld [vmem:[#allocation8 + $0x80] sm:$0xff] }
  0xa4   : > { %407 = vadd.xlane.f32.xlu0 %v406_v49  ;;  %v355_v49 = vld [vmem:[#allocation8 + $0x78] sm:$0xff] }
  0xa5   : > { %v517_v56 = vmul.f32 %v515_v54, %v337_v42  ;;  %v460_v57 = vmul.f32 %v458_v55, %v337_v42  ;;  %v567_v58 = vcombine.high %v458_v55, %v458_v55  ;;  %v357_v54 = vld [vmem:[#allocation8 + $0x88] sm:$0xff] }
  0xa7   : > { %v518_v59 = vsel %vm405_vm0, %v517_v56, 0.0  ;;  %v461_v60 = vsel %vm405_vm0, %v460_v57, 0.0  ;;  %v569_v61 = vmul.f32 %v567_v58, %v337_v42 }
  0xa8   : > { %519 = vadd.xlane.f32.xlu1 %v518_v59  ;;  %462 = vadd.xlane.f32.xlu0 %v461_v60  ;;  %v358_v59 = vld [vmem:[#allocation8 + $0x90] sm:$0xff]  ;;  %v359_v60 = vld [vmem:[#allocation8 + $0x98] sm:$0xff] }
  0xa9   : > { %v570_v62 = vsel %vm405_vm0, %v569_v61, 0.0  ;;  %v360_v61 = vld [vmem:[#allocation8 + $0xa0] sm:$0xff] }
  0xac   : > { %571 = vadd.xlane.f32.xlu1 %v570_v62 }
  0xbd   : > { %521 = vrot.lane.b32.xlu1 %v468_v1, %s1314_s17 }
  0xbe   : > { %469 = vrot.lane.b32.xlu0 %v468_v1, %s1315_s30 }
  0xc1   : > { %573 = vrot.lane.b32.xlu1 %v468_v1, %s1316_s16 }
 0x12d   : > { %v408_v2 = vpop.xlane.xlu0 %407 }
 0x12e   : > { %v409_v3 = vadd.f32 %v408_v2, %v339_v0  ;;  %v361_v2 = vld [vmem:[#allocation8 + $0xa8] sm:$0xff] }
 0x130   : > { %v410_v4 = vsub.f32 0.0, %v409_v3  ;;  %v362_v3 = vld [vmem:[#allocation8 + $0xb0] sm:$0xff] }
 0x131   : > { %v520_v6 = vpop.xlane.xlu1 %519  ;;  %v463_v7 = vpop.xlane.xlu0 %462 }
 0x132   : > { %v411_v5 = vmul.f32 1.442695, %v410_v4  ;;  %v363_v4 = vld [vmem:[#allocation8 + $0xb8] sm:$0xff] }
 0x134   : > { %1085 = vpow2.f32 %v411_v5 }
 0x135   : > { %v572_v8 = vpop.xlane.xlu1 %571  ;;  %v470_v9 = vpop.permute.xlu0 %469 }
 0x136   : > { %v472_v10 = vadd.f32 %v470_v9, %v463_v7  ;;  %v365_v9 = vld [vmem:[#allocation8 + $0xc8] sm:$0xff] }
 0x138   : > { %v473_v11 = vsub.f32 0.0, %v472_v10  ;;  %v366_v10 = vld [vmem:[#allocation8 + $0xd0] sm:$0xff] }
 0x139   : > { %v522_v12 = vpop.permute.xlu1 %521 }
 0x13a   : > { %v474_v14 = vmul.f32 1.442695, %v473_v11  ;;  %v524_v15 = vadd.f32 %v522_v12, %v520_v6 }
 0x13c   : > { %1087 = vpow2.f32 %v474_v14  ;;  %v525_v17 = vsub.f32 0.0, %v524_v15  ;;  %v367_v14 = vld [vmem:[#allocation8 + $0xd8] sm:$0xff]  ;;  %v368_v15 = vld [vmem:[#allocation8 + $0xe0] sm:$0xff] }
 0x13d   : > { %v574_v18 = vpop.permute.xlu1 %573 }
 0x13e   : > { %v526_v19 = vmul.f32 1.442695, %v525_v17  ;;  %v576_v20 = vadd.f32 %v574_v18, %v572_v8  ;;  %v364_v8 = vld [vmem:[#allocation8 + $0xc0] sm:$0xff] }
 0x140   : > { %v577_v21 = vsub.f32 0.0, %v576_v20  ;;  %v371_v20 = vld [vmem:[#allocation8 + $0xf8] sm:$0xff] }
 0x141   : > { %v1086_v13 = vpop.eup %1085 }
 0x142   : > { %v413_v16 = vadd.f32 1.0, %v1086_v13  ;;  %v578_v22 = vmul.f32 1.442695, %v577_v21 }
 0x144   : > { %1089 = vrcp.f32 %v413_v16  ;;  %v369_v16 = vld [vmem:[#allocation8 + $0xe8] sm:$0xff] }
 0x145   : > { %1091 = vpow2.f32 %v526_v19  ;;  %v370_v19 = vld [vmem:[#allocation8 + $0xf0] sm:$0xff] }
 0x146   : > { %1093 = vpow2.f32 %v578_v22 }
 0x149   : > { %v1088_v23 = vpop.eup %1087 }
 0x14a   : > { %v476_v25 = vadd.f32 1.0, %v1088_v23 }
 0x14c   : > { %1095 = vrcp.f32 %v476_v25 }
 0x151   : > { %v1090_v24 = vpop.eup %1089 }
 0x152   : > { %945 = vpush %v1090_v24  ;;  %v1092_v26 = vpop.eup %1091 }
 0x153   : > { %v528_v27 = vadd.f32 1.0, %v1092_v26  ;;  %v1094_v28 = vpop.eup %1093 }
 0x154   : > { %v580_v29 = vadd.f32 1.0, %v1094_v28 }
 0x155   : > { %1097 = vrcp.f32 %v528_v27 }
 0x156   : > { %1099 = vrcp.f32 %v580_v29 }
 0x159   : > { %v1096_v30 = vpop.eup %1095 }
 0x15a   : > { %947 = vpush %v1096_v30 }
 0x162   : > { %v1098_v31 = vpop.eup %1097 }
 0x163   : > { %949 = vpush %v1098_v31  ;;  %v1100_v32 = vpop.eup %1099 }
 0x164   : > { %951 = vpush %v1100_v32 }
 0x183   : > { %s946_s9 = spop %945 }
 0x184   : > { %v418_v42 = vstv %s946_s9 }
 0x185   : > { %v420_v50 = vmul.f32 %v418_v42, %v340_v33  ;;  %v421_v51 = vmul.f32 %v418_v42, %v341_v34  ;;  %v422_v52 = vmul.f32 %v418_v42, %v342_v35  ;;  %v423_v55 = vmul.f32 %v418_v42, %v343_v36 }
 0x186   : > { %v424_v56 = vmul.f32 %v418_v42, %v344_v37  ;;  %v425_v57 = vmul.f32 %v418_v42, %v345_v38  ;;  %v426_v58 = vmul.f32 %v418_v42, %v346_v39  ;;  %v427_v62 = vmul.f32 %v418_v42, %v347_v40  ;;  %v372_v37 = vld [vmem:[#allocation8 + $0x100] sm:$0xff] }
 0x187   : > { %v428_v63 = vmul.f32 %v418_v42, %v348_v41  ;;  %v429_v0 = vmul.f32 %v418_v42, %v349_v43  ;;  %v430_v1 = vmul.f32 %v418_v42, %v350_v44  ;;  %v431_v5 = vmul.f32 %v418_v42, %v351_v45  ;;  %v374_v43 = vld [vmem:[#allocation8 + $0x110] sm:$0xff]  ;;  %v375_v44 = vld [vmem:[#allocation8 + $0x118] sm:$0xff] }
 0x188   : > { %v432_v6 = vmul.f32 %v418_v42, %v352_v46  ;;  %v433_v7 = vmul.f32 %v418_v42, %v353_v47  ;;  %v434_v12 = vmul.f32 %v418_v42, %v354_v48  ;;  %v435_v13 = vmul.f32 %v418_v42, %v355_v49  ;;  %v373_v42 = vld [vmem:[#allocation8 + $0x108] sm:$0xff]  ;;  %v376_v49 = vld [vmem:[#allocation8 + $0x120] sm:$0xff] }
 0x18b   : > { %s948_s29 = spop %947 }
 0x18c   : > { %v481_v11 = vstv %s948_s29 }
 0x18d   : > { %v483_v17 = vmul.f32 %v481_v11, %v356_v53  ;;  %v484_v18 = vmul.f32 %v481_v11, %v357_v54  ;;  %v485_v21 = vmul.f32 %v481_v11, %v358_v59  ;;  %v486_v22 = vmul.f32 %v481_v11, %v359_v60  ;;  %v377_v53 = vld [vmem:[#allocation8 + $0x128] sm:$0xff]  ;;  %v378_v54 = vld [vmem:[#allocation8 + $0x130] sm:$0xff] }
 0x18e   : > { %v487_v23 = vmul.f32 %v481_v11, %v360_v61  ;;  %v488_v24 = vmul.f32 %v481_v11, %v361_v2  ;;  %v489_v25 = vmul.f32 %v481_v11, %v362_v3  ;;  %v490_v26 = vmul.f32 %v481_v11, %v363_v4  ;;  %v382_v2 = vld [vmem:[#allocation8 + $0x150] sm:$0xff]  ;;  %v383_v3 = vld [vmem:[#allocation8 + $0x158] sm:$0xff]  ;;  %v384_v4 = vld [vmem:[#allocation8 + $0x160] sm:$0xff] }
 0x18f   : > { %v491_v27 = vmul.f32 %v481_v11, %v364_v8  ;;  %v492_v28 = vmul.f32 %v481_v11, %v365_v9  ;;  %v493_v29 = vmul.f32 %v481_v11, %v366_v10  ;;  %v494_v30 = vmul.f32 %v481_v11, %v367_v14  ;;  %v387_v8 = vld [vmem:[#allocation8 + $0x178] sm:$0xff] }
 0x190   : > { %v495_v31 = vmul.f32 %v481_v11, %v368_v15  ;;  %v496_v32 = vmul.f32 %v481_v11, %v369_v16  ;;  %v497_v33 = vmul.f32 %v481_v11, %v370_v19  ;;  %v498_v34 = vmul.f32 %v481_v11, %v371_v20 }
 0x191   : > { %v499_v35 = vadd.f32 %v483_v17, %v420_v50  ;;  %v500_v36 = vadd.f32 %v484_v18, %v421_v51  ;;  %v501_v38 = vadd.f32 %v485_v21, %v422_v52  ;;  %v502_v39 = vadd.f32 %v486_v22, %v423_v55  ;;  %v379_v52 = vld [vmem:[#allocation8 + $0x138] sm:$0xff]  ;;  %v380_v55 = vld [vmem:[#allocation8 + $0x140] sm:$0xff] }
 0x192   : > { %v503_v40 = vadd.f32 %v487_v23, %v424_v56  ;;  %v504_v41 = vadd.f32 %v488_v24, %v425_v57  ;;  %v505_v45 = vadd.f32 %v489_v25, %v426_v58  ;;  %v506_v46 = vadd.f32 %v490_v26, %v427_v62  ;;  %v381_v56 = vld [vmem:[#allocation8 + $0x148] sm:$0xff]  ;;  %v388_v21 = vld [vmem:[#allocation8 + $0x180] sm:$0xff] }
 0x193   : > { %v507_v47 = vadd.f32 %v491_v27, %v428_v63  ;;  %v508_v48 = vadd.f32 %v492_v28, %v429_v0  ;;  %v509_v59 = vadd.f32 %v493_v29, %v430_v1  ;;  %v510_v50 = vadd.f32 %v494_v30, %v431_v5  ;;  %v385_v63 = vld [vmem:[#allocation8 + $0x168] sm:$0xff]  ;;  %v386_v0 = vld [vmem:[#allocation8 + $0x170] sm:$0xff]  ;;  %v391_v28 = vld [vmem:[#allocation8 + $0x198] sm:$0xff] }
 0x194   : > { %s950_s14 = spop %949  ;;  %v511_v51 = vadd.f32 %v495_v31, %v432_v6  ;;  %v512_v60 = vadd.f32 %v496_v32, %v433_v7  ;;  %v513_v57 = vadd.f32 %v497_v33, %v434_v12  ;;  %v514_v61 = vadd.f32 %v498_v34, %v435_v13  ;;  %v389_v26 = vld [vmem:[#allocation8 + $0x188] sm:$0xff]  ;;  %v390_v27 = vld [vmem:[#allocation8 + $0x190] sm:$0xff]  ;;  %v392_v33 = vld [vmem:[#allocation8 + $0x1a0] sm:$0xff] }
 0x195   : > { %s952_s1 = spop %951  ;;  %v533_v58 = vstv %s950_s14  ;;  %v393_v34 = vld [vmem:[#allocation8 + $0x1a8] sm:$0xff] }
 0x196   : > { %v1556_v62 = vstv %s952_s1  ;;  %v535_v9 = vmul.f32 %v533_v58, %v372_v37  ;;  %v536_v10 = vmul.f32 %v533_v58, %v373_v42  ;;  %v537_v1 = vmul.f32 %v533_v58, %v374_v43  ;;  %v394_v37 = vld [vmem:[#allocation8 + $0x1b0] sm:$0xff] }
 0x197   : > { %v538_v5 = vmul.f32 %v533_v58, %v375_v44  ;;  %v539_v6 = vmul.f32 %v533_v58, %v376_v49  ;;  %v540_v7 = vmul.f32 %v533_v58, %v377_v53  ;;  %v541_v11 = vmul.f32 %v533_v58, %v378_v54  ;;  %v395_v53 = vld [vmem:[#allocation8 + $0x1b8] sm:$0xff]  ;;  %v396_v54 = vld [vmem:[#allocation8 + $0x1c0] sm:$0xff] }
 0x198   : > { %v542_v14 = vmul.f32 %v533_v58, %v379_v52  ;;  %v543_v15 = vmul.f32 %v533_v58, %v380_v55  ;;  %v544_v12 = vmul.f32 %v533_v58, %v381_v56  ;;  %v545_v13 = vmul.f32 %v533_v58, %v382_v2  ;;  %v398_v55 = vld [vmem:[#allocation8 + $0x1d0] sm:$0xff]  ;;  %v399_v56 = vld [vmem:[#allocation8 + $0x1d8] sm:$0xff] }
 0x199   : > { %v546_v16 = vmul.f32 %v533_v58, %v383_v3  ;;  %v547_v17 = vmul.f32 %v533_v58, %v384_v4  ;;  %v548_v18 = vmul.f32 %v533_v58, %v385_v63  ;;  %v549_v19 = vmul.f32 %v533_v58, %v386_v0 }
 0x19a   : > { %v550_v20 = vmul.f32 %v533_v58, %v387_v8  ;;  %v551_v22 = vadd.f32 %v535_v9, %v499_v35  ;;  %v552_v23 = vadd.f32 %v536_v10, %v500_v36  ;;  %v553_v24 = vadd.f32 %v537_v1, %v501_v38  ;;  %v397_v35 = vld [vmem:[#allocation8 + $0x1c8] sm:$0xff] }
 0x19b   : > { %v554_v25 = vadd.f32 %v538_v5, %v502_v39  ;;  %v555_v29 = vadd.f32 %v539_v6, %v503_v40  ;;  %v556_v30 = vadd.f32 %v540_v7, %v504_v41  ;;  %v557_v31 = vadd.f32 %v541_v11, %v505_v45  ;;  %v400_v40 = vld [vmem:[#allocation8 + $0x1e0] sm:$0xff]  ;;  %v401_v41 = vld [vmem:[#allocation8 + $0x1e8] sm:$0xff]  ;;  %v402_v45 = vld [vmem:[#allocation8 + $0x1f0] sm:$0xff] }
 0x19c   : > { %v558_v32 = vadd.f32 %v542_v14, %v506_v46  ;;  %v559_v42 = vadd.f32 %v543_v15, %v507_v47  ;;  %v560_v43 = vadd.f32 %v544_v12, %v508_v48  ;;  %v561_v44 = vadd.f32 %v545_v13, %v509_v59  ;;  %v403_v46 = vld [vmem:[#allocation8 + $0x1f8] sm:$0xff] }
 0x19d   : > { %v562_v49 = vadd.f32 %v546_v16, %v510_v50  ;;  %v563_v36 = vadd.f32 %v547_v17, %v511_v51  ;;  %v564_v38 = vadd.f32 %v548_v18, %v512_v60  ;;  %v565_v39 = vadd.f32 %v549_v19, %v513_v57  ;;  %v859_v12 = vld [vmem:[%s1708_s15] ss:$0 sm:$0xff] }
 0x19e   : > { %v566_v52 = vadd.f32 %v550_v20, %v514_v61  ;;  %v587_v2 = vmul.f32 %v1556_v62, %v388_v21  ;;  %v588_v47 = vmul.f32 %v1556_v62, %v389_v26  ;;  %v589_v48 = vmul.f32 %v1556_v62, %v390_v27 }
 0x19f   : > { %v590_v59 = vmul.f32 %v1556_v62, %v391_v28  ;;  %v591_v50 = vmul.f32 %v1556_v62, %v392_v33  ;;  %v592_v51 = vmul.f32 %v1556_v62, %v393_v34  ;;  %v593_v60 = vmul.f32 %v1556_v62, %v394_v37 }
 0x1a0   : > { %v594_v57 = vmul.f32 %v1556_v62, %v395_v53  ;;  %v595_v61 = vmul.f32 %v1556_v62, %v396_v54  ;;  %v596_v3 = vmul.f32 %v1556_v62, %v397_v35  ;;  %v597_v4 = vmul.f32 %v1556_v62, %v398_v55 }
 0x1a1   : > { %v598_v58 = vmul.f32 %v1556_v62, %v399_v56  ;;  %v599_v63 = vmul.f32 %v1556_v62, %v400_v40  ;;  %v600_v0 = vmul.f32 %v1556_v62, %v401_v41  ;;  %v601_v8 = vmul.f32 %v1556_v62, %v402_v45 }
 0x1a2   : > { %v602_v9 = vmul.f32 %v1556_v62, %v403_v46  ;;  %v603_v10 = vadd.f32 %v587_v2, %v551_v22  ;;  %v604_v1 = vadd.f32 %v588_v47, %v552_v23  ;;  %v605_v5 = vadd.f32 %v589_v48, %v553_v24 }
 0x1a3   : > { %v606_v6 = vadd.f32 %v590_v59, %v554_v25  ;;  %v607_v7 = vadd.f32 %v591_v50, %v555_v29  ;;  %v608_v11 = vadd.f32 %v592_v51, %v556_v30  ;;  %v609_v14 = vadd.f32 %v593_v60, %v557_v31 }
 0x1a4   : > { %v610_v15 = vadd.f32 %v594_v57, %v558_v32  ;;  %v611_v13 = vadd.f32 %v595_v61, %v559_v42  ;;  %v612_v16 = vadd.f32 %v596_v3, %v560_v43  ;;  %v613_v17 = vadd.f32 %v597_v4, %v561_v44 }
 0x1a5   : > { %v614_v18 = vadd.f32 %v598_v58, %v562_v49  ;;  %v615_v19 = vadd.f32 %v599_v63, %v563_v36  ;;  %v616_v20 = vadd.f32 %v600_v0, %v564_v38  ;;  %v617_v21 = vadd.f32 %v601_v8, %v565_v39 }
 0x1a6   : > { %v618_v62 = vadd.f32 %v602_v9, %v566_v52  ;;  %v626_v22 = vmul.f32 %v859_v12, %v603_v10  ;;  %v627_v23 = vmul.f32 %v859_v12, %v604_v1  ;;  %v628_v24 = vmul.f32 %v859_v12, %v605_v5 }
 0x1a7   : > { %v629_v25 = vmul.f32 %v859_v12, %v606_v6  ;;  %v630_v26 = vmul.f32 %v859_v12, %v607_v7  ;;  %v631_v27 = vmul.f32 %v859_v12, %v608_v11  ;;  %v632_v28 = vmul.f32 %v859_v12, %v609_v14 }
 0x1a8   : > { %v633_v29 = vmul.f32 %v859_v12, %v610_v15  ;;  %v634_v30 = vmul.f32 %v859_v12, %v611_v13  ;;  %v635_v31 = vmul.f32 %v859_v12, %v612_v16  ;;  %v636_v32 = vmul.f32 %v859_v12, %v613_v17 }
 0x1a9   : > { %v637_v33 = vmul.f32 %v859_v12, %v614_v18  ;;  %v638_v34 = vmul.f32 %v859_v12, %v615_v19  ;;  %v639_v37 = vmul.f32 %v859_v12, %v616_v20  ;;  %v640_v42 = vmul.f32 %v859_v12, %v617_v21 }
 0x1aa   : > { %v641_v43 = vmul.f32 %v859_v12, %v618_v62  ;;  %v901_v44 = vpack.c.bf16 %v627_v23, %v626_v22  ;;  %v906_v49 = vpack.c.bf16 %v629_v25, %v628_v24  ;;  %v911_v53 = vpack.c.bf16 %v631_v27, %v630_v26 }
 0x1ab   : > { %v916_v54 = vpack.c.bf16 %v633_v29, %v632_v28  ;;  %v921_v35 = vpack.c.bf16 %v635_v31, %v634_v30  ;;  %v926_v36 = vpack.c.bf16 %v637_v33, %v636_v32  ;;  %v931_v38 = vpack.c.bf16 %v639_v37, %v638_v34 }
 0x1ac   : > { %v936_v39 = vpack.c.bf16 %v641_v43, %v640_v42  ;;  %902 = vst [vmem:[%s1529_s13] sm:$0xff] %v901_v44   ;;  %938 = vst [vmem:[%s1529_s13 + $0x8] sm:$0xff] %v906_v49  }
 0x1ad   : > { %939 = vst [vmem:[%s1529_s13 + $0x10] sm:$0xff] %v911_v53   ;;  %940 = vst [vmem:[%s1529_s13 + $0x18] sm:$0xff] %v916_v54  }
 0x1ae   : > { %941 = vst [vmem:[%s1529_s13 + $0x20] sm:$0xff] %v921_v35   ;;  %942 = vst [vmem:[%s1529_s13 + $0x28] sm:$0xff] %v926_v36  }
 0x1af   : > { %943 = vst [vmem:[%s1529_s13 + $0x30] sm:$0xff] %v931_v38   ;;  %944 = vst [vmem:[%s1529_s13 + $0x38] sm:$0xff] %v936_v39  }
 0x1b0 PF: > { %s1709_s3 = sld [smem:[#allocation14_spill]]  ;;  %s736_s7 = sshll.u32 %s1529_s13, 4  ;;  %s1592_s7 = int_to_ptr.vmem [resolvable:$true] %s736_s7 }
 0x1b1   : > { %s1710_s5 = sld [smem:[#allocation17_spill]]  ;;  %s1596_s10 = scalar_lea.sflag [#allocation5], %s283_s2 }
 0x1b2   : > { %s1711_s21 = sld [smem:[#allocation24_spill]]  ;;  %s1181_s17 = scalar_lea.vmem %s1592_s7, 1024 }
 0x1b3   : > { %p1182_p0 = scmp.ne.s32.totalorder %s1592_s7, %s1181_s17  ;;  %s1317_s30 = smov [#allocation9]  }
 0x1b4   : > { %s1185_s16 = sshll.u32 %s1317_s30, 4  ;;  %s1186_s16 = int_to_ptr.vmem [resolvable:$false] %s1185_s16 }
 0x1b5   : > { %s1187_s9 = scalar_lea.vmem %s1186_s16, 2048  ;;  %p1188_p1 = scmp.lt.s32.totalorder %s1592_s7, %s1186_s16 }
 0x1b6   : > { %s897_s25 = sshll.u32 %s1709_s3, 10  ;;  %p1189_p4 = scmp.lt.s32.totalorder %s1187_s9, %s1181_s17 }
 0x1b7   : > { %p1713_p5 = scmp.ne.s32.totalorder %s1710_s5, 0 }
 0x1b8   : > { %s1712_s11 = smov %s1711_s21  ;;  %s1589_s24 = scalar_lea.hbm %s1711_s21, %s897_s25 }
 0x1b9   : > { %p1183_p8 = pnand %p1182_p0, %p1713_p5  ;;  %p1190_p2 = por %p1189_p4, %p1188_p1 }
 0x1bb   : > { %p1184_p13 = pneg %p1183_p8 }
 0x1bd   : > { %p1191_p9 = pnand %p1190_p2, %p1184_p13 }
 0x1bf   : > { %1194 = shalt.err (!%p1191_p9)
}
 0x1c0   : > { %s1195_s2 = scalar_lea.hbm %s1589_s24, 1024  ;;  %s1199_s14 = scalar_lea.hbm %s1712_s11, 2048 }
 0x1c1   : > { %p1196_p11 = scmp.ne.s32.totalorder %s1589_s24, %s1195_s2  ;;  %p1200_p6 = scmp.lt.s32.totalorder %s1589_s24, %s1712_s11 }
 0x1c2   : > { %p1201_p7 = scmp.lt.s32.totalorder %s1199_s14, %s1195_s2 }
 0x1c3   : > { %p1197_p12 = pnand %p1196_p11, %p1713_p5 }
 0x1c4   : > { %p1202_p10 = por %p1201_p7, %p1200_p6 }
 0x1c5   : > { %p1198_p3 = pneg %p1197_p12 }
 0x1c7   : > { %p1203_p0 = pnand %p1202_p10, %p1198_p3 }
 0x1c9   : > { %1206 = shalt.err (!%p1203_p0)
}
 0x1ca   : > { %s1318_s18 = smov 64   ;;  %s1319_s15 = smov 4  }
 0x1cb   : > { %963 = dma.vmem_to_hbm [thread:$0]  (%p1713_p5), %s1592_s7, 1024, %s1589_s24, %s1596_s10, %s1318_s18, %s1318_s18, %s1319_s15  }
 0x1cc PF: > { %s1714_s3 = sld [smem:[#allocation16_spill]] }
 0x1cd   : > { %s1715_s25 = sld [smem:[#allocation13_spill]] }
 0x1ce   : > { %s1716_s28 = sld [smem:[#allocation18_spill]] }
 0x1d2   : > { %p985_p8 = scmp.ge.s32.totalorder %s1714_s3, 2 }
 0x1d3   : > { %s751_s8 = sand.u32 1, %s1715_s25  }
 0x1d4   : > { %p1717_p13 = scmp.ne.s32.totalorder %s1716_s28, 0  ;;  %s752_s21 = scalar_lea.sflag [#allocation5], %s751_s8 }
 0x1d6   : > { %p977_p1 = pnand %p985_p8, %p1717_p13 }
 0x1d8   : > { %p978_p4 = pneg %p977_p1 }
 0x1da   : > { %1260 = dma.done.wait (%p978_p4), %s752_s21, 1024  }
 0x1db   : > { %1262 = vsyncadd (%p978_p4), %s752_s21, 4294966272  ;;  %s22_s28 = sadd.s32 1, %s1714_s3   ;;  %s1718_s24 = sld [smem:[#allocation15_spill]] }
 0x1dc   : > { %p19_p2 = scmp.ge.s32.totalorder %s22_s28, 6   ;;  %s1719_s5 = sld [smem:[#allocation19_spill]] }
 0x1dd   : > { %s1720_s18 = smov %s1269_s19  ;;  %s1721_s19 = smov %s1273_s20 }
 0x1de   : > { %s1722_s20 = smov %s1499_s26  ;;  %s1723_s21 = smov %s1281_s22 }
 0x1df   : > { %s1724_s22 = smov %s1285_s23  ;;  %s1725_s23 = smov %s1504_s4 }
 0x1e0   : > { %s1726_s25 = smov %s1301_s27  ;;  %s1728_s27 = smov %s1734_s6 }
 0x1e1   :  { %21 = sbr.rel (!%p19_p2) target bundleno = 16 (0x10), region = 101 }
 0x1e2   : > { %s1727_s26 = smov %s1719_s5 }
 0x1e6   :  { %757 = vsyncpa [#allocation4], 1 }
 0x1e7   :  { %759 = vsyncpa [#allocation4 + $0x1], 1 }
 0x1e8   :  { %760 = vsyncpa [#allocation7], 1 }
 0x1e9   :  { %761 = vsyncpa [#allocation5], 1 }
 0x1ea   :  { %763 = vsyncpa [#allocation5 + $0x1], 1 }

</bundles_post_ra>
